<compile_context>
chip_gen: v5e
topology: v5e:2x2
jax: 0.10.0
libtpu: 0.0.40
codegen_flags: <defaults>
</compile_context>

<pallas_src>
import functools

import jax
import jax.numpy as jnp
from jax import lax
from jax.experimental import pallas as pl
from jax.experimental.pallas import tpu as pltpu

_BIG = 1.0e9  # column-norm filler for padded distance columns (kills the hinge)


# --------------------------------------------------------------------------- #
# Kernel
# --------------------------------------------------------------------------- #
def _dshsd_kernel(tu_ref, y_ref, cat_t_ref, yt_ref, sqa_ref, out_ref, *,
                  m, n, n_class, n_pad, c_pad, tr, lc_scale, ld_scale,
                  mask_rows):
    f32 = jnp.float32

    # Row block of tanh(u): already tanh'ed and bf16-cast in the wrapper.
    tu_bf = tu_ref[...]                                      # (TR, bit) bf16
    tu32 = tu_bf.astype(f32)
    sq_r = jnp.sum(tu32 * tu32, axis=1, keepdims=True)       # (TR, 1)

    # One MXU pass against the fused, pre-transposed resident operand
    # [-2*tanh(u) | W]^T : (TR, bit) @ (bit, N_pad + C_pad).
    prod = lax.dot_general(tu_bf, cat_t_ref[...],
                           (((1,), (0,)), ((), ())),
                           preferred_element_type=f32)       # (TR, N_pad+C_pad)
    gram_m2 = prod[:, :n_pad]   # = -2 <tanh(u_i), tanh(u_j)>  (128-aligned view)
    o = prod[:, n_pad:]         # classifier logits             (128-aligned view)

    # Pairwise squared distances (−2 already folded into the MXU RHS; padded
    # columns carry sq_a = BIG so their hinge term is exactly zero).
    dist = jnp.maximum(sq_r + sqa_ref[...] + gram_m2, 0.0)   # (TR, N_pad)

    # Similarity Gram: (TR, C_pad) @ (C_pad, N_pad); 0/1 labels exact in bf16.
    y_r = y_ref[...]                                         # (TR, C_pad) f32
    gram_y = lax.dot_general(y_r.astype(jnp.bfloat16), yt_ref[...],
                             (((1,), (0,)), ((), ())),
                             preferred_element_type=f32)     # (TR, N_pad)

    # DSH hinge map; the 1/2 is folded into ld_scale.
    ld_elems = jnp.where(gram_y == 0.0, jnp.maximum(m - dist, 0.0), dist)
    if mask_rows:  # only traced in when the batch was row-padded
        row = (pl.program_id(0) * tr
               + lax.broadcasted_iota(jnp.int32, (tr, 1), 0))
        ld_elems = jnp.where(row < n, ld_elems, 0.0)
    ld_partial = jnp.sum(ld_elems)

    # Softmax cross-entropy; padded logit columns are masked out of the LSE
    # only (padded label columns are zero so they drop out of the product).
    if c_pad != n_class:
        col = lax.broadcasted_iota(jnp.int32, o.shape, 1)
        o_lse = jnp.where(col < n_class, o, -1e30)
    else:
        o_lse = o
    o_max = jnp.max(o_lse, axis=1, keepdims=True)
    lse = jnp.log(jnp.sum(jnp.exp(o_lse - o_max), axis=1, keepdims=True)) + o_max
    lc_partial = -jnp.sum((o - lse) * y_r)

    # Per-row-block contribution, stored lane-dense.
    block_loss = lc_partial * lc_scale + ld_partial * ld_scale
    out_ref[...] = jnp.full(out_ref.shape, block_loss, dtype=f32)


# --------------------------------------------------------------------------- #
# Sizing helpers (generation-aware VMEM budgeting)
# --------------------------------------------------------------------------- #
def _round_up(x, mult):
    return ((x + mult - 1) // mult) * mult


def _vmem_capacity_bytes():
    try:
        return int(pltpu.get_tpu_info().vmem_capacity_bytes)
    except Exception:
        return 64 * 1024 * 1024  # conservative fallback (v7x per-TC size)


def _pick_row_tile(n, bit, n_pad, c_pad, budget_bytes):
    """Largest row tile whose working set (single-buffered residents +
    double-buffered row blocks + f32 temporaries) fits the VMEM budget."""
    resident = (bit * (n_pad + c_pad) * 2      # fused [-2*tanh(u) | W]^T, bf16
                + c_pad * n_pad * 2            # y^T, bf16
                + 8 * n_pad * 4)               # column norms (sublane-padded)
    row_cap = max(16, _round_up(n, 8))
    for tr in (512, 256, 128, 64, 32, 16):
        if tr > row_cap:
            continue
        row_io = 2 * tr * (bit * 2 + c_pad * 4)   # double-buffered row blocks
        out_io = 2 * 8 * 128 * 4                  # double-buffered output block
        temps = (tr * (n_pad + c_pad) * 4         # fused MXU product (f32)
                 + 3 * tr * n_pad * 4             # dist / label-gram / hinge map
                 + 3 * tr * c_pad * 4)            # masked logits / exp / CE
        if resident + row_io + out_io + int(1.25 * temps) <= budget_bytes:
            return tr
    return 16


# --------------------------------------------------------------------------- #
# Wrapper
# --------------------------------------------------------------------------- #
def dshsd_loss(u, y, w, *, bit, alpha):
    """u: (N, bit) pre-tanh codes; y: (N, C) one/multi-hot float labels;
    w: (C, bit) fc weight (nn.Linear, no bias)."""
    n, b = u.shape
    n_class = y.shape[1]
    assert b == bit and w.shape == (n_class, bit)
    m = 2.0 * bit

    f32, bf16 = jnp.float32, jnp.bfloat16

    # ---- pad class / sample axes to lane boundaries -----------------------
    n_pad = _round_up(n, 128)
    c_pad = _round_up(n_class, 128)

    # ---- generation-aware VMEM budget & row tile --------------------------
    cap = _vmem_capacity_bytes()
    vmem_limit = min(max(int(cap * 0.85), 32 * 1024 * 1024), 128 * 1024 * 1024)
    tr = _pick_row_tile(n, bit, n_pad, c_pad, int(cap * 0.70))
    n_rows_pad = _round_up(n, tr)
    grid = (n_rows_pad // tr,)

    # ---- hoisted loop-invariant preprocessing (tanh, casts, norms, T) -----
    tu_bf = jnp.tanh(u.astype(f32)).astype(bf16)                 # (N, bit)
    tu32 = tu_bf.astype(f32)                                     # bf16-rounded
    sq = jnp.sum(tu32 * tu32, axis=1)                            # (N,)

    sqa = jnp.full((1, n_pad), _BIG, dtype=f32).at[0, :n].set(sq)

    # Fused, pre-transposed MXU RHS: columns [0:n] = (-2*tanh(u))^T,
    # columns [n_pad : n_pad+C] = W^T, everything else zero.
    cat_t = jnp.zeros((bit, n_pad + c_pad), dtype=bf16)
    cat_t = cat_t.at[:, :n].set(jnp.transpose(-2.0 * tu_bf))
    cat_t = cat_t.at[:, n_pad:n_pad + n_class].set(jnp.transpose(w.astype(bf16)))

    # Pre-transposed bf16 label matrix for the similarity Gram.
    yt = jnp.zeros((c_pad, n_pad), dtype=bf16)
    yt = yt.at[:n_class, :n].set(jnp.transpose(y.astype(bf16)))

    # Row-block inputs (rows padded to a multiple of the tile with zeros).
    tu_p = jnp.zeros((n_rows_pad, bit), dtype=bf16).at[:n].set(tu_bf)
    y_p = jnp.zeros((n_rows_pad, c_pad), dtype=f32).at[:n, :n_class].set(
        y.astype(f32))

    kernel = functools.partial(
        _dshsd_kernel, m=float(m), n=int(n), n_class=int(n_class),
        n_pad=int(n_pad), c_pad=int(c_pad), tr=int(tr),
        lc_scale=float(1.0 / n), ld_scale=float(alpha * 0.5 / (n * n)),
        mask_rows=bool(n_rows_pad != n))

    cost = pl.CostEstimate(
        flops=int(2 * n_rows_pad * (n_pad + c_pad) * bit
                  + 2 * n_rows_pad * n_pad * c_pad
                  + 8 * n_rows_pad * n_pad),
        transcendentals=int(n_rows_pad * c_pad),
        bytes_accessed=int(tu_p.size * 2 + y_p.size * 4 + cat_t.size * 2
                           + yt.size * 2 + sqa.size * 4 + grid[0] * 8 * 128 * 4))

    def _call(single_buffer_residents):
        res_kw = ({"pipeline_mode": pl.Buffered(1)}
                  if single_buffer_residents else {})
        return pl.pallas_call(
            kernel,
            out_shape=jax.ShapeDtypeStruct((grid[0], 8, 128), jnp.float32),
            grid_spec=pltpu.PrefetchScalarGridSpec(
                num_scalar_prefetch=0,
                grid=grid,
                in_specs=[
                    pl.BlockSpec((tr, bit), lambda i: (i, 0)),           # tanh(u) rows
                    pl.BlockSpec((tr, c_pad), lambda i: (i, 0)),         # label rows
                    pl.BlockSpec((bit, n_pad + c_pad),                   # fused RHS
                                 lambda i: (0, 0), **res_kw),
                    pl.BlockSpec((c_pad, n_pad),                         # y^T
                                 lambda i: (0, 0), **res_kw),
                    pl.BlockSpec((1, n_pad),                             # col norms
                                 lambda i: (0, 0), **res_kw),
                ],
                out_specs=pl.BlockSpec((1, 8, 128), lambda i: (i, 0, 0)),
            ),
            compiler_params=pltpu.CompilerParams(
                dimension_semantics=("parallel",),
                vmem_limit_bytes=int(vmem_limit),
            ),
            cost_estimate=cost,
        )(tu_p, y_p, cat_t, yt, sqa)

    try:
        partials = _call(True)
    except Exception:
        # pl.Buffered(1) not supported on this jax/libtpu -> default buffering.
        partials = _call(False)

    # Tiny host-side reduction of the per-row-block partial losses.
    return jnp.sum(partials[:, 0, 0])


# --------------------------------------------------------------------------- #
# Pure-JAX reference (mirrors the PyTorch forward, softmax branch)
# --------------------------------------------------------------------------- #
def dshsd_loss_ref(u, y, w, *, bit, alpha):
    m = 2.0 * bit
    u = jnp.tanh(u)
    dist = jnp.sum((u[:, None, :] - u[None, :, :]) ** 2, axis=2)
    s = (y @ y.T == 0).astype(jnp.float32)
    ld = (1.0 - s) / 2.0 * dist + s / 2.0 * jnp.clip(m - dist, 0.0, None)
    ld = alpha * jnp.mean(ld)
    o = u @ w.T
    lc = jnp.mean(jnp.sum(-jax.nn.log_softmax(o, axis=1) * y, axis=1))
    return lc + ld


if __name__ == "__main__":
    # Small, deterministic example shapes (exercises row padding + 2 blocks).
    N, BIT, N_CLASS = 24, 32, 10
    ALPHA = 0.1

    key = jax.random.PRNGKey(0)
    k_u, k_lbl, k_w = jax.random.split(key, 3)

    u = jax.random.normal(k_u, (N, BIT), dtype=jnp.float32)
    labels = jax.random.randint(k_lbl, (N,), 0, N_CLASS)
    y = jax.nn.one_hot(labels, N_CLASS, dtype=jnp.float32)
    # Deterministic fc weight init (like nn.Linear: U(-1/sqrt(bit), 1/sqrt(bit))).
    bound = 1.0 / (BIT ** 0.5)
    w = jax.random.uniform(k_w, (N_CLASS, BIT), dtype=jnp.float32,
                           minval=-bound, maxval=bound)

    loss = dshsd_loss(u, y, w, bit=BIT, alpha=ALPHA)
    jax.block_until_ready(loss)

    ref = dshsd_loss_ref(u, y, w, bit=BIT, alpha=ALPHA)
    # bf16 MXU operands with f32 accumulation -> small absolute/relative slack.
    assert jnp.allclose(loss, ref, rtol=1e-2, atol=2e-2), (loss, ref)

    print("KERNEL_OK")
</pallas_src>

<mosaic_0001>
module attributes {stable_mosaic.version = 11 : i64} {
  func.func @_dshsd_kernel(%arg0: i32, %arg1: memref<16x32xbf16, #tpu.memory_space<vmem>>, %arg2: memref<16x128xf32, #tpu.memory_space<vmem>>, %arg3: memref<32x256xbf16, #tpu.memory_space<vmem>>, %arg4: memref<128x128xbf16, #tpu.memory_space<vmem>>, %arg5: memref<1x128xf32, #tpu.memory_space<vmem>>, %arg6: memref<1x8x128xf32, #tpu.memory_space<vmem>>) attributes {dimension_semantics = [#tpu.dimension_semantics<parallel>], iteration_bounds = array<i64: 2>, scalar_prefetch = 0 : i64, scratch_operands = 0 : i64, tpu.core_type = #tpu.core_type<tc>, window_params = [{transform_indices = @transform_0, window_bounds = array<i64: 16, 32>}, {transform_indices = @transform_1, window_bounds = array<i64: 16, 128>}, {pipeline_mode = #tpu.pipeline_mode<synchronous>, transform_indices = @transform_2, window_bounds = array<i64: 32, 256>}, {pipeline_mode = #tpu.pipeline_mode<synchronous>, transform_indices = @transform_3, window_bounds = array<i64: 128, 128>}, {pipeline_mode = #tpu.pipeline_mode<synchronous>, transform_indices = @transform_4, window_bounds = array<i64: 1, 128>}, {transform_indices = @transform_5, window_bounds = array<i64: 1, 8, 128>}]} {
    %c0 = arith.constant 0 : index
    %c0_0 = arith.constant 0 : index
    %0 = vector.load %arg1[%c0, %c0_0] : memref<16x32xbf16, #tpu.memory_space<vmem>>, vector<16x32xbf16>
    %1 = arith.extf %0 : vector<16x32xbf16> to vector<16x32xf32>
    %2 = arith.mulf %1, %1 : vector<16x32xf32>
    %cst = arith.constant dense<0.000000e+00> : vector<16xf32>
    %3 = vector.multi_reduction <add>, %2, %cst [1] : vector<16x32xf32> to vector<16xf32>
    %4 = vector.shape_cast %3 : vector<16xf32> to vector<16x1xf32>
    %c0_1 = arith.constant 0 : index
    %c0_2 = arith.constant 0 : index
    %5 = vector.load %arg3[%c0_1, %c0_2] : memref<32x256xbf16, #tpu.memory_space<vmem>>, vector<32x256xbf16>
    %cst_3 = arith.constant dense<0.000000e+00> : vector<16x256xf32>
    %6 = tpu.matmul %0, %5, %cst_3 {dimension_numbers = #tpu.dot_dimension_numbers<[1], [0], [0], [1], [0, 0, 1, 1], [], []>} : vector<16x32xbf16>, vector<32x256xbf16>, vector<16x256xf32> -> vector<16x256xf32>
    %7 = vector.extract_strided_slice %6 {offsets = [0, 0], sizes = [16, 128], strides = [1, 1]} : vector<16x256xf32> to vector<16x128xf32>
    %8 = vector.extract_strided_slice %6 {offsets = [0, 128], sizes = [16, 128], strides = [1, 1]} : vector<16x256xf32> to vector<16x128xf32>
    %c0_4 = arith.constant 0 : index
    %c0_5 = arith.constant 0 : index
    %9 = vector.load %arg5[%c0_4, %c0_5] : memref<1x128xf32, #tpu.memory_space<vmem>>, vector<1x128xf32>
    %10 = vector.broadcast %4 : vector<16x1xf32> to vector<16x128xf32>
    %11 = vector.broadcast %9 : vector<1x128xf32> to vector<16x128xf32>
    %12 = arith.addf %10, %11 : vector<16x128xf32>
    %13 = arith.addf %12, %7 : vector<16x128xf32>
    %cst_6 = arith.constant 0.000000e+00 : f32
    %14 = vector.broadcast %cst_6 : f32 to vector<16x128xf32>
    %15 = arith.maximumf %13, %14 : vector<16x128xf32>
    %c0_7 = arith.constant 0 : index
    %c0_8 = arith.constant 0 : index
    %16 = vector.load %arg2[%c0_7, %c0_8] : memref<16x128xf32, #tpu.memory_space<vmem>>, vector<16x128xf32>
    %17 = arith.truncf %16 : vector<16x128xf32> to vector<16x128xbf16>
    %c0_9 = arith.constant 0 : index
    %c0_10 = arith.constant 0 : index
    %18 = vector.load %arg4[%c0_9, %c0_10] : memref<128x128xbf16, #tpu.memory_space<vmem>>, vector<128x128xbf16>
    %cst_11 = arith.constant dense<0.000000e+00> : vector<16x128xf32>
    %19 = tpu.matmul %17, %18, %cst_11 {dimension_numbers = #tpu.dot_dimension_numbers<[1], [0], [0], [1], [0, 0, 1, 1], [], []>} : vector<16x128xbf16>, vector<128x128xbf16>, vector<16x128xf32> -> vector<16x128xf32>
    %cst_12 = arith.constant 0.000000e+00 : f32
    %20 = vector.broadcast %cst_12 : f32 to vector<16x128xf32>
    %21 = arith.cmpf oeq, %19, %20 : vector<16x128xf32>
    %cst_13 = arith.constant 6.400000e+01 : f32
    %22 = vector.broadcast %cst_13 : f32 to vector<16x128xf32>
    %23 = arith.subf %22, %15 : vector<16x128xf32>
    %cst_14 = arith.constant 0.000000e+00 : f32
    %24 = vector.broadcast %cst_14 : f32 to vector<16x128xf32>
    %25 = arith.maximumf %23, %24 : vector<16x128xf32>
    %26 = arith.select %21, %25, %15 : vector<16x128xi1>, vector<16x128xf32>
    %c16_i32 = arith.constant 16 : i32
    %27 = arith.muli %arg0, %c16_i32 : i32
    %28 = tpu.iota {dimensions = array<i32: 0>} : vector<16x1xi32>
    %29 = vector.broadcast %27 : i32 to vector<16x1xi32>
    %30 = arith.addi %29, %28 : vector<16x1xi32>
    %c24_i32 = arith.constant 24 : i32
    %31 = vector.broadcast %c24_i32 : i32 to vector<16x1xi32>
    %32 = arith.cmpi slt, %30, %31 : vector<16x1xi32>
    %cst_15 = arith.constant 0.000000e+00 : f32
    %33 = vector.shape_cast %32 : vector<16x1xi1> to vector<16x1xi1>
    %34 = vector.broadcast %33 : vector<16x1xi1> to vector<16x128xi1>
    %35 = vector.broadcast %cst_15 : f32 to vector<16x128xf32>
    %36 = arith.select %34, %26, %35 : vector<16x128xi1>, vector<16x128xf32>
    %37 = vector.shape_cast %36 : vector<16x128xf32> to vector<1x16x128xf32>
    %cst_16 = arith.constant dense<0.000000e+00> : vector<1xf32>
    %38 = vector.multi_reduction <add>, %37, %cst_16 [1, 2] : vector<1x16x128xf32> to vector<1xf32>
    %39 = vector.shape_cast %38 : vector<1xf32> to vector<1x1x1xf32>
    %40 = vector.extract %39[0, 0, 0] : f32 from vector<1x1x1xf32>
    %41 = tpu.iota {dimensions = array<i32: 1>} : vector<16x128xi32>
    %c10_i32 = arith.constant 10 : i32
    %42 = vector.broadcast %c10_i32 : i32 to vector<16x128xi32>
    %43 = arith.cmpi slt, %41, %42 : vector<16x128xi32>
    %cst_17 = arith.constant -1.000000e+30 : f32
    %44 = vector.broadcast %cst_17 : f32 to vector<16x128xf32>
    %45 = arith.select %43, %8, %44 : vector<16x128xi1>, vector<16x128xf32>
    %cst_18 = arith.constant dense<0xFF800000> : vector<16xf32>
    %46 = vector.multi_reduction <maximumf>, %45, %cst_18 [1] : vector<16x128xf32> to vector<16xf32>
    %47 = vector.shape_cast %46 : vector<16xf32> to vector<16x1xf32>
    %48 = vector.broadcast %47 : vector<16x1xf32> to vector<16x128xf32>
    %49 = arith.subf %45, %48 : vector<16x128xf32>
    %50 = math.exp %49 : vector<16x128xf32>
    %cst_19 = arith.constant dense<0.000000e+00> : vector<16xf32>
    %51 = vector.multi_reduction <add>, %50, %cst_19 [1] : vector<16x128xf32> to vector<16xf32>
    %52 = vector.shape_cast %51 : vector<16xf32> to vector<16x1xf32>
    %53 = math.log %52 : vector<16x1xf32>
    %54 = arith.addf %53, %47 : vector<16x1xf32>
    %55 = vector.broadcast %54 : vector<16x1xf32> to vector<16x128xf32>
    %56 = arith.subf %8, %55 : vector<16x128xf32>
    %57 = arith.mulf %56, %16 : vector<16x128xf32>
    %58 = vector.shape_cast %57 : vector<16x128xf32> to vector<1x16x128xf32>
    %cst_20 = arith.constant dense<0.000000e+00> : vector<1xf32>
    %59 = vector.multi_reduction <add>, %58, %cst_20 [1, 2] : vector<1x16x128xf32> to vector<1xf32>
    %60 = vector.shape_cast %59 : vector<1xf32> to vector<1x1x1xf32>
    %61 = vector.extract %60[0, 0, 0] : f32 from vector<1x1x1xf32>
    %cst_21 = arith.constant 0.000000e+00 : f32
    %62 = arith.subf %cst_21, %61 : f32
    %cst_22 = arith.constant 0.0416666679 : f32
    %63 = arith.mulf %62, %cst_22 : f32
    %cst_23 = arith.constant 8.68055576E-5 : f32
    %64 = arith.mulf %40, %cst_23 : f32
    %65 = arith.addf %63, %64 : f32
    %66 = vector.broadcast %65 : f32 to vector<1x8x128xf32>
    %c0_24 = arith.constant 0 : index
    %c0_25 = arith.constant 0 : index
    %c0_26 = arith.constant 0 : index
    %67 = vector.load %arg6[%c0_24, %c0_25, %c0_26] : memref<1x8x128xf32, #tpu.memory_space<vmem>>, vector<1x8x128xf32>
    tpu.vector_store %arg6[%c0_24, %c0_25, %c0_26], %66 {strides = array<i32>} : memref<1x8x128xf32, #tpu.memory_space<vmem>>, vector<1x8x128xf32>,
    return
  }
  func.func @transform_0(%arg0: i32) -> (i32, i32) {
    %c0_i32 = arith.constant 0 : i32
    %c0_i32_0 = arith.constant 0 : i32
    return %arg0, %c0_i32 : i32, i32
  }
  func.func @transform_1(%arg0: i32) -> (i32, i32) {
    %c0_i32 = arith.constant 0 : i32
    %c0_i32_0 = arith.constant 0 : i32
    return %arg0, %c0_i32 : i32, i32
  }
  func.func @transform_2(%arg0: i32) -> (i32, i32) {
    %c0_i32 = arith.constant 0 : i32
    %c0_i32_0 = arith.constant 0 : i32
    %c0_i32_1 = arith.constant 0 : i32
    return %c0_i32, %c0_i32_0 : i32, i32
  }
  func.func @transform_3(%arg0: i32) -> (i32, i32) {
    %c0_i32 = arith.constant 0 : i32
    %c0_i32_0 = arith.constant 0 : i32
    %c0_i32_1 = arith.constant 0 : i32
    return %c0_i32, %c0_i32_0 : i32, i32
  }
  func.func @transform_4(%arg0: i32) -> (i32, i32) {
    %c0_i32 = arith.constant 0 : i32
    %c0_i32_0 = arith.constant 0 : i32
    %c0_i32_1 = arith.constant 0 : i32
    return %c0_i32, %c0_i32_0 : i32, i32
  }
  func.func @transform_5(%arg0: i32) -> (i32, i32, i32) {
    %c0_i32 = arith.constant 0 : i32
    %c0_i32_0 = arith.constant 0 : i32
    %c0_i32_1 = arith.constant 0 : i32
    return %arg0, %c0_i32, %c0_i32_0 : i32, i32, i32
  }
}

module attributes {stable_mosaic.version = 11 : i64} {
  func.func @_dshsd_kernel(%arg0: i32, %arg1: memref<16x32xbf16, #tpu.memory_space<vmem>>, %arg2: memref<16x128xf32, #tpu.memory_space<vmem>>, %arg3: memref<32x256xbf16, #tpu.memory_space<vmem>>, %arg4: memref<128x128xbf16, #tpu.memory_space<vmem>>, %arg5: memref<1x128xf32, #tpu.memory_space<vmem>>, %arg6: memref<1x8x128xf32, #tpu.memory_space<vmem>>) attributes {dimension_semantics = [#tpu.dimension_semantics<parallel>], iteration_bounds = array<i64: 2>, scalar_prefetch = 0 : i64, scratch_operands = 0 : i64, tpu.core_type = #tpu.core_type<tc>, window_params = [{transform_indices = @transform_0, window_bounds = array<i64: 16, 32>}, {transform_indices = @transform_1, window_bounds = array<i64: 16, 128>}, {pipeline_mode = #tpu.pipeline_mode<synchronous>, transform_indices = @transform_2, window_bounds = array<i64: 32, 256>}, {pipeline_mode = #tpu.pipeline_mode<synchronous>, transform_indices = @transform_3, window_bounds = array<i64: 128, 128>}, {pipeline_mode = #tpu.pipeline_mode<synchronous>, transform_indices = @transform_4, window_bounds = array<i64: 1, 128>}, {transform_indices = @transform_5, window_bounds = array<i64: 1, 8, 128>}]} {
    %c0 = arith.constant 0 : index
    %c0_0 = arith.constant 0 : index
    %0 = vector.load %arg1[%c0, %c0_0] : memref<16x32xbf16, #tpu.memory_space<vmem>>, vector<16x32xbf16>
    %1 = arith.extf %0 : vector<16x32xbf16> to vector<16x32xf32>
    %2 = arith.mulf %1, %1 : vector<16x32xf32>
    %cst = arith.constant dense<0.000000e+00> : vector<16xf32>
    %3 = vector.multi_reduction <add>, %2, %cst [1] : vector<16x32xf32> to vector<16xf32>
    %4 = vector.shape_cast %3 : vector<16xf32> to vector<16x1xf32>
    %c0_1 = arith.constant 0 : index
    %c0_2 = arith.constant 0 : index
    %5 = vector.load %arg3[%c0_1, %c0_2] : memref<32x256xbf16, #tpu.memory_space<vmem>>, vector<32x256xbf16>
    %cst_3 = arith.constant dense<0.000000e+00> : vector<16x256xf32>
    %6 = tpu.matmul %0, %5, %cst_3 {dimension_numbers = #tpu.dot_dimension_numbers<[1], [0], [0], [1], [0, 0, 1, 1], [], []>} : vector<16x32xbf16>, vector<32x256xbf16>, vector<16x256xf32> -> vector<16x256xf32>
    %7 = vector.extract_strided_slice %6 {offsets = [0, 0], sizes = [16, 128], strides = [1, 1]} : vector<16x256xf32> to vector<16x128xf32>
    %8 = vector.extract_strided_slice %6 {offsets = [0, 128], sizes = [16, 128], strides = [1, 1]} : vector<16x256xf32> to vector<16x128xf32>
    %c0_4 = arith.constant 0 : index
    %c0_5 = arith.constant 0 : index
    %9 = vector.load %arg5[%c0_4, %c0_5] : memref<1x128xf32, #tpu.memory_space<vmem>>, vector<1x128xf32>
    %10 = vector.broadcast %4 : vector<16x1xf32> to vector<16x128xf32>
    %11 = vector.broadcast %9 : vector<1x128xf32> to vector<16x128xf32>
    %12 = arith.addf %10, %11 : vector<16x128xf32>
    %13 = arith.addf %12, %7 : vector<16x128xf32>
    %cst_6 = arith.constant 0.000000e+00 : f32
    %14 = vector.broadcast %cst_6 : f32 to vector<16x128xf32>
    %15 = arith.maximumf %13, %14 : vector<16x128xf32>
    %c0_7 = arith.constant 0 : index
    %c0_8 = arith.constant 0 : index
    %16 = vector.load %arg2[%c0_7, %c0_8] : memref<16x128xf32, #tpu.memory_space<vmem>>, vector<16x128xf32>
    %17 = arith.truncf %16 : vector<16x128xf32> to vector<16x128xbf16>
    %c0_9 = arith.constant 0 : index
    %c0_10 = arith.constant 0 : index
    %18 = vector.load %arg4[%c0_9, %c0_10] : memref<128x128xbf16, #tpu.memory_space<vmem>>, vector<128x128xbf16>
    %cst_11 = arith.constant dense<0.000000e+00> : vector<16x128xf32>
    %19 = tpu.matmul %17, %18, %cst_11 {dimension_numbers = #tpu.dot_dimension_numbers<[1], [0], [0], [1], [0, 0, 1, 1], [], []>} : vector<16x128xbf16>, vector<128x128xbf16>, vector<16x128xf32> -> vector<16x128xf32>
    %cst_12 = arith.constant 0.000000e+00 : f32
    %20 = vector.broadcast %cst_12 : f32 to vector<16x128xf32>
    %21 = arith.cmpf oeq, %19, %20 : vector<16x128xf32>
    %cst_13 = arith.constant 6.400000e+01 : f32
    %22 = vector.broadcast %cst_13 : f32 to vector<16x128xf32>
    %23 = arith.subf %22, %15 : vector<16x128xf32>
    %cst_14 = arith.constant 0.000000e+00 : f32
    %24 = vector.broadcast %cst_14 : f32 to vector<16x128xf32>
    %25 = arith.maximumf %23, %24 : vector<16x128xf32>
    %26 = arith.select %21, %25, %15 : vector<16x128xi1>, vector<16x128xf32>
    %c16_i32 = arith.constant 16 : i32
    %27 = arith.muli %arg0, %c16_i32 : i32
    %28 = tpu.iota {dimensions = array<i32: 0>} : vector<16x1xi32>
    %29 = vector.broadcast %27 : i32 to vector<16x1xi32>
    %30 = arith.addi %29, %28 : vector<16x1xi32>
    %c24_i32 = arith.constant 24 : i32
    %31 = vector.broadcast %c24_i32 : i32 to vector<16x1xi32>
    %32 = arith.cmpi slt, %30, %31 : vector<16x1xi32>
    %cst_15 = arith.constant 0.000000e+00 : f32
    %33 = vector.shape_cast %32 : vector<16x1xi1> to vector<16x1xi1>
    %34 = vector.broadcast %33 : vector<16x1xi1> to vector<16x128xi1>
    %35 = vector.broadcast %cst_15 : f32 to vector<16x128xf32>
    %36 = arith.select %34, %26, %35 : vector<16x128xi1>, vector<16x128xf32>
    %37 = vector.shape_cast %36 : vector<16x128xf32> to vector<1x16x128xf32>
    %cst_16 = arith.constant dense<0.000000e+00> : vector<1xf32>
    %38 = vector.multi_reduction <add>, %37, %cst_16 [1, 2] : vector<1x16x128xf32> to vector<1xf32>
    %39 = vector.shape_cast %38 : vector<1xf32> to vector<1x1x1xf32>
    %40 = vector.extract %39[0, 0, 0] : f32 from vector<1x1x1xf32>
    %41 = tpu.iota {dimensions = array<i32: 1>} : vector<16x128xi32>
    %c10_i32 = arith.constant 10 : i32
    %42 = vector.broadcast %c10_i32 : i32 to vector<16x128xi32>
    %43 = arith.cmpi slt, %41, %42 : vector<16x128xi32>
    %cst_17 = arith.constant -1.000000e+30 : f32
    %44 = vector.broadcast %cst_17 : f32 to vector<16x128xf32>
    %45 = arith.select %43, %8, %44 : vector<16x128xi1>, vector<16x128xf32>
    %cst_18 = arith.constant dense<0xFF800000> : vector<16xf32>
    %46 = vector.multi_reduction <maximumf>, %45, %cst_18 [1] : vector<16x128xf32> to vector<16xf32>
    %47 = vector.shape_cast %46 : vector<16xf32> to vector<16x1xf32>
    %48 = vector.broadcast %47 : vector<16x1xf32> to vector<16x128xf32>
    %49 = arith.subf %45, %48 : vector<16x128xf32>
    %50 = math.exp %49 : vector<16x128xf32>
    %cst_19 = arith.constant dense<0.000000e+00> : vector<16xf32>
    %51 = vector.multi_reduction <add>, %50, %cst_19 [1] : vector<16x128xf32> to vector<16xf32>
    %52 = vector.shape_cast %51 : vector<16xf32> to vector<16x1xf32>
    %53 = math.log %52 : vector<16x1xf32>
    %54 = arith.addf %53, %47 : vector<16x1xf32>
    %55 = vector.broadcast %54 : vector<16x1xf32> to vector<16x128xf32>
    %56 = arith.subf %8, %55 : vector<16x128xf32>
    %57 = arith.mulf %56, %16 : vector<16x128xf32>
    %58 = vector.shape_cast %57 : vector<16x128xf32> to vector<1x16x128xf32>
    %cst_20 = arith.constant dense<0.000000e+00> : vector<1xf32>
    %59 = vector.multi_reduction <add>, %58, %cst_20 [1, 2] : vector<1x16x128xf32> to vector<1xf32>
    %60 = vector.shape_cast %59 : vector<1xf32> to vector<1x1x1xf32>
    %61 = vector.extract %60[0, 0, 0] : f32 from vector<1x1x1xf32>
    %cst_21 = arith.constant 0.000000e+00 : f32
    %62 = arith.subf %cst_21, %61 : f32
    %cst_22 = arith.constant 0.0416666679 : f32
    %63 = arith.mulf %62, %cst_22 : f32
    %cst_23 = arith.constant 8.68055576E-5 : f32
    %64 = arith.mulf %40, %cst_23 : f32
    %65 = arith.addf %63, %64 : f32
    %66 = vector.broadcast %65 : f32 to vector<1x8x128xf32>
    %c0_24 = arith.constant 0 : index
    %c0_25 = arith.constant 0 : index
    %c0_26 = arith.constant 0 : index
    %67 = vector.load %arg6[%c0_24, %c0_25, %c0_26] : memref<1x8x128xf32, #tpu.memory_space<vmem>>, vector<1x8x128xf32>
    tpu.vector_store %arg6[%c0_24, %c0_25, %c0_26], %66 {strides = array<i32>} : memref<1x8x128xf32, #tpu.memory_space<vmem>>, vector<1x8x128xf32>,
    return
  }
  func.func @transform_0(%arg0: i32) -> (i32, i32) {
    %c0_i32 = arith.constant 0 : i32
    %c0_i32_0 = arith.constant 0 : i32
    return %arg0, %c0_i32 : i32, i32
  }
  func.func @transform_1(%arg0: i32) -> (i32, i32) {
    %c0_i32 = arith.constant 0 : i32
    %c0_i32_0 = arith.constant 0 : i32
    return %arg0, %c0_i32 : i32, i32
  }
  func.func @transform_2(%arg0: i32) -> (i32, i32) {
    %c0_i32 = arith.constant 0 : i32
    %c0_i32_0 = arith.constant 0 : i32
    %c0_i32_1 = arith.constant 0 : i32
    return %c0_i32, %c0_i32_0 : i32, i32
  }
  func.func @transform_3(%arg0: i32) -> (i32, i32) {
    %c0_i32 = arith.constant 0 : i32
    %c0_i32_0 = arith.constant 0 : i32
    %c0_i32_1 = arith.constant 0 : i32
    return %c0_i32, %c0_i32_0 : i32, i32
  }
  func.func @transform_4(%arg0: i32) -> (i32, i32) {
    %c0_i32 = arith.constant 0 : i32
    %c0_i32_0 = arith.constant 0 : i32
    %c0_i32_1 = arith.constant 0 : i32
    return %c0_i32, %c0_i32_0 : i32, i32
  }
  func.func @transform_5(%arg0: i32) -> (i32, i32, i32) {
    %c0_i32 = arith.constant 0 : i32
    %c0_i32_0 = arith.constant 0 : i32
    %c0_i32_1 = arith.constant 0 : i32
    return %arg0, %c0_i32, %c0_i32_0 : i32, i32, i32
  }
}

</mosaic_0001>

<bundles_post_ra>
// kernel: tpu_custom_call.1
= control target key start
LH: loop header
LB: loop body
LE: loop exit
PB: predicated region body
PF: predicated region fallthrough
CT: control target
= control target key end

     0   :  { %s1332_s0 = inlined_call_operand.hbm [shape: bf16[32,32], index: 0, kind: input, shape index: {}]   ;;  %s1333_s1 = inlined_call_operand.hbm [shape: f32[32,128], index: 1, kind: input, shape index: {}]   ;;  %s1334_s2 = inlined_call_operand.hbm [shape: bf16[32,256], index: 2, kind: input, shape index: {}]   ;;  %s1335_s3 = inlined_call_operand.hbm [shape: bf16[128,128], index: 3, kind: input, shape index: {}]   ;;  %s1336_s4 = inlined_call_operand.vmem [shape: f32[1,128], index: 4, kind: input, shape index: {}]   ;;  %s1337_s5 = inlined_call_operand.hbm [shape: f32[2,8,128], index: 5, kind: output, shape index: {}]  }
   0x1   :  { %1343 = sst [smem:[#allocation18_spill]] %s1334_s2 }
   0x2   :  { %1344 = sst [smem:[#allocation19_spill]] %s1335_s3 }
   0x3   :  { %10 = vsyncpa [#allocation3], 0 }
   0x4   :  { %12 = vsyncpa [#allocation3 + $0x1], 0 }
   0x5   :  { %13 = vsyncpa [#allocation6], 0 }
   0x6   :  { %15 = vsyncpa [#allocation6 + $0x1], 0 }
   0x7   :  { %16 = vsyncpa [#allocation9], 0 }
   0x8   :  { %17 = vsyncpa [#allocation4], 0 }
   0x9   :  { %19 = vsyncpa [#allocation4 + $0x1], 0  ;;  %s1109_s18 = smov 0   ;;  %s1111_s19 = smov 0  }
   0xa   :  { %s1113_s20 = smov 0   ;;  %s1115_s21 = smov 0  }
   0xb LB: > { %1345 = sst [smem:[#allocation16_spill]] %s1067_s20  ;;  %s1130_s22 = sadd.s32 4294967295, %s1071_s21   ;;  %s1071_s21 = sphi %s1115_s21, %s1363_s21   ;;  %s1067_s20 = sphi %s1113_s20, %s1360_s20   ;;  %s1063_s19 = sphi %s1111_s19, %s1362_s19   ;;  %s1059_s18 = sphi %s1109_s18, %s1361_s18  }
   0xc   : > { %s693_s23 = sadd.s32 4294967294, %s1071_s21   ;;  %p45_p0 = scmp.ne.s32.totalorder %s1063_s19, %s1059_s18 }
   0xd   : > { %p46_p1 = scmp.eq.s32.totalorder %s1130_s22, 0  ;;  %p158_p2 = scmp.eq.s32.totalorder %s1130_s22, 1 }
   0xe   : > { %p164_p3 = scmp.eq.s32.totalorder %s693_s23, 1  ;;  %p694_p5 = scmp.ge.s32.totalorder %s1071_s21, 1 }
   0xf   : > { %p1139_p4 = por %p46_p1, %p45_p0  ;;  %p171_p7 = scmp.lt.s32.totalorder %s1071_s21, 3 }
  0x10   : > { %p1144_p6 = por %p164_p3, %p45_p0  ;;  %s1348_s2 = sld [smem:[#allocation18_spill]] }
  0x11   : > { %p1152_p8 = pnand %p694_p5, %p171_p7  ;;  %s1073_s30 = smov [#allocation7]  }
  0x12   : > { %s184_s6 = sshll.u32 %s1073_s30, 4  ;;  %s1350_s3 = sld [smem:[#allocation19_spill]]  ;;  %s185_s6 = int_to_ptr.vmem [resolvable:$true] %s184_s6 }
  0x13   : > { %p802_p9 = pneg %p1152_p8  ;;  %s1338_s10 = smov 128  }
  0x14   : > { %s1339_s11 = smov 8   ;;  %s1076_s12 = smov [#allocation8]  }
  0x15   : > { %p803_p10 = pnand %p802_p9, %p46_p1  ;;  %s198_s13 = sshll.u32 %s1076_s12, 4  ;;  %s199_s13 = int_to_ptr.vmem [resolvable:$true] %s198_s13 }
  0x16   : > { %s182_s28 = sshll.u32 %s1348_s2, 4  ;;  %s1340_s14 = smov 64   ;;  %s183_s28 = int_to_ptr.hbm [resolvable:$true] %s182_s28 }
  0x17   : > { %805 = dma.hbm_to_vmem [thread:$0]  (!%p803_p10), %s183_s28, 512, %s185_s6, [#allocation6], %s1338_s10, %s1338_s10, %s1339_s11  }
  0x18   : > { %s196_s9 = sshll.u32 %s1350_s3, 4  ;;  %s1341_s15 = smov 4   ;;  %s197_s9 = int_to_ptr.hbm [resolvable:$true] %s196_s9 }
  0x19   : > { %808 = dma.hbm_to_vmem [thread:$0]  (!%p803_p10), %s197_s9, 1024, %s199_s13, [#allocation9], %s1340_s14, %s1340_s14, %s1341_s15  }
  0x1a   : > { %s1171_s16 = sadd.s32 1, %s1071_s21   ;;  %s32_s23 = sadd.s32 1, %s1067_s20 }
  0x1b   : > { %s29_s17 = ssub.s32 %s1071_s21, %s1171_s16  ;;  %p39_p13 = scmp.ne.s32.totalorder %s1067_s20, %s1063_s19 }
  0x1c   : > { %p30_p12 = scmp.eq.s32.totalorder %s29_s17, 0  ;;  %p40_p0 = scmp.eq.s32.totalorder %s1071_s21, 0 }
  0x1d   : > { %p1184_p5 = por %p158_p2, %p39_p13  ;;  %p822_p7 = scmp.lt.s32.totalorder %s1071_s21, 2 }
  0x1e   : > { %s1180_s26 = scalar_select %p30_p12, %s1067_s20, %s32_s23  }
  0x1f   : > { %p41_p3 = por %p40_p0, %p39_p13  ;;  %s1190_s28 = sand.u32 1, %s1067_s20  }
  0x20   : > { %1351 = sst [smem:[#allocation17_spill]] %s1180_s26  ;;  %s698_s30 = sshll.u32 %s1190_s28, 3 }
  0x21   : > { %s769_s6 = sshll.u32 %s1071_s21, 3  ;;  %s219_s12 = scalar_lea.vmem [#allocation2], %s698_s30 }
  0x22   : > { %s224_s9 = scalar_lea.hbm %s1332_s0, %s769_s6  ;;  %s227_s13 = sshll.u32 %s219_s12, 4  ;;  %s228_s13 = int_to_ptr.vmem [resolvable:$true] %s227_s13 }
  0x23   : > { %s225_s17 = sshll.u32 %s224_s9, 4  ;;  %p1197_p2 = pnand %p822_p7, %p41_p3  ;;  %s226_s17 = int_to_ptr.hbm [resolvable:$true] %s225_s17 }
  0x24   : > { %s237_s10 = sand.u32 1, %s1071_s21   ;;  %s701_s11 = sshll.u32 %s1190_s28, 4 }
  0x25   : > { %s216_s14 = scalar_lea.sflag [#allocation3], %s1190_s28  ;;  %s933_s15 = sshra.s32 %s226_s17, 4  ;;  %s934_s15 = int_to_ptr.hbm [resolvable:$true] %s933_s15 }
  0x26   : > { %s935_s2 = scalar_lea.hbm %s934_s15, 8  ;;  %p937_p10 = pneg %p1197_p2 }
  0x27   : > { %p936_p9 = scmp.ne.s32.totalorder %s934_s15, %s935_s2  ;;  %s940_s7 = scalar_lea.hbm %s1332_s0, 16 }
  0x28   : > { %p941_p0 = scmp.lt.s32.totalorder %s934_s15, %s1332_s0  ;;  %p942_p3 = scmp.lt.s32.totalorder %s940_s7, %s935_s2 }
  0x29   : > { %p938_p12 = pnand %p937_p10, %p936_p9 }
  0x2a   : > { %p943_p7 = por %p942_p3, %p941_p0 }
  0x2b   : > { %p939_p13 = pneg %p938_p12 }
  0x2d   : > { %p944_p11 = pnand %p943_p7, %p939_p13 }
  0x2f   : > { %947 = shalt.err (!%p944_p11)
}
  0x30   : > { %s1354_s28 = smov 4   ;;  %s1355_s12 = smov 64  }
  0x31   : > { %812 = dma.hbm_to_vmem [thread:$0]  (!%p1197_p2), %s226_s17, 128, %s228_s13, %s216_s14, %s1355_s12, %s1355_s12, %s1354_s28  }
  0x32   : > { %s770_s3 = sshll.u32 %s1071_s21, 4  ;;  %s241_s20 = scalar_lea.vmem [#allocation5], %s701_s11 }
  0x33   : > { %s246_s6 = scalar_lea.hbm %s1333_s1, %s770_s3  ;;  %s249_s8 = sshll.u32 %s241_s20, 4  ;;  %s250_s8 = int_to_ptr.vmem [resolvable:$true] %s249_s8 }
  0x34   : > { %s247_s15 = sshll.u32 %s246_s6, 4  ;;  %s238_s2 = scalar_lea.sflag [#allocation6], %s237_s10  ;;  %s248_s15 = int_to_ptr.hbm [resolvable:$true] %s247_s15 }
  0x35   : > { %s963_s7 = sshra.s32 %s248_s15, 4  ;;  %s970_s17 = scalar_lea.hbm %s1333_s1, 32  ;;  %s964_s7 = int_to_ptr.hbm [resolvable:$true] %s963_s7 }
  0x36   : > { %s965_s9 = scalar_lea.hbm %s964_s7, 16  ;;  %p971_p13 = scmp.lt.s32.totalorder %s964_s7, %s1333_s1 }
  0x37   : > { %p966_p11 = scmp.ne.s32.totalorder %s964_s7, %s965_s9  ;;  %p972_p0 = scmp.lt.s32.totalorder %s970_s17, %s965_s9 }
  0x39   : > { %p968_p9 = pnand %p966_p11, %p937_p10  ;;  %p973_p3 = por %p972_p0, %p971_p13 }
  0x3b   : > { %p969_p12 = pneg %p968_p9 }
  0x3d   : > { %p974_p7 = pnand %p973_p3, %p969_p12 }
  0x3f   : > { %977 = shalt.err (!%p974_p7)
}
  0x40   : > { %s1356_s20 = smov 8   ;;  %s1357_s10 = smov 128  }
  0x41   : > { %815 = dma.hbm_to_vmem [thread:$0]  (!%p1197_p2), %s248_s15, 256, %s250_s8, %s238_s2, %s1357_s10, %s1357_s10, %s1356_s20  }
  0x42   : > { %261 = sbr.rel (%p1152_p8) target bundleno = 672 (0x2a0), region = 40  ;;  %s1241_s11 = sand.u32 (!%p1152_p8), 1, %s1063_s19  }
  0x43   : > { %s705_s28 = sshll.u32 (!%p1152_p8), %s1241_s11, 3  ;;  %s264_s12 = scalar_lea.sflag (!%p1152_p8), [#allocation3], %s1241_s11 }
  0x44   : > { %s1247_s30 = scalar_lea.vmem (!%p1152_p8), [#allocation2], %s705_s28 }
  0x47   : > { %1038 = dma.done.wait (%p1139_p4), %s264_s12, 128  }
  0x48   : > { %1040 = vsyncadd (%p1139_p4), %s264_s12, 4294967168  ;;  %s273_s29 = sand.u32 1, %s1130_s22   ;;  %s706_s23 = sshll.u32 %s1241_s11, 4 }
  0x49   : > { %s274_s6 = scalar_lea.sflag [#allocation6], %s273_s29  ;;  %s1255_s8 = scalar_lea.vmem [#allocation5], %s706_s23 }
  0x4a   : > { %1042 = dma.done.wait (%p1139_p4), %s274_s6, 256  }
  0x4b   : > { %1044 = vsyncadd (%p1139_p4), %s274_s6, 4294967040 }
  0x4c   : > { %1046 = dma.done.wait (%p46_p1), [#allocation6], 512  }
  0x4d   : > { %1048 = vsyncadd (%p46_p1), [#allocation6], 4294966784 }
  0x4e   : > { %1050 = dma.done.wait (%p46_p1), [#allocation9], 1024  }
  0x4f   : > { %1052 = vsyncadd (%p46_p1), [#allocation9], 4294966272  ;;  %v774_v0 = vld [vmem:[#allocation7 + $0x14] sm:$0xf]  ;;  %v726_v1 = vld [vmem:[#allocation7 + $0x18] sm:$0xf0]  ;;  %v496_v21 = vlaneseq }
  0x50   : > { %v772_v2 = vld [vmem:[#allocation7 + $0x4] sm:$0xf]  ;;  %v729_v3 = vor.u32 %v774_v0, %v726_v1  ;;  %v718_v4 = vld [vmem:[#allocation7 + $0x8] sm:$0xf0]  ;;  %v771_v6 = vld [vmem:[%s1247_s30] sm:$0xff]  ;;  %vm329_vm0 = vcmask 261120  }
  0x51   : > { %v721_v5 = vor.u32 %v772_v2, %v718_v4  ;;  %v783_v7 = vld [vmem:[#allocation8 + $0x38] sm:$0xff]  ;;  %v782_v8 = vld [vmem:[#allocation8 + $0x30] sm:$0xff]  ;;  %v716_v12 = vld [vmem:[#allocation7] sm:$0xf]  ;;  %v521_v23 = vand.u32 127, %v496_v21  ;;  %s764_s2 = sshll.u32 %s1130_s22, 4 }
  0x52   : > { %388 = vmatpush.bf16.msra.mxu1 %v729_v3  ;;  %473 = vmatpush.bf16.msra.mxu2 %v783_v7  ;;  %v724_v9 = vld [vmem:[#allocation7 + $0x10] sm:$0xf]  ;;  %v775_v10 = vld [vmem:[#allocation7 + $0x14] sm:$0xf0]  ;;  %v773_v13 = vld [vmem:[#allocation7 + $0x4] sm:$0xf0]  ;;  %v499_v62 = vstv %s764_s2 }
  0x53   : > { %v725_v11 = vor.u32 %v775_v10, %v724_v9  ;;  %v323_v14 = vld [vmem:[%s1247_s30] sm:$0xff]   ;;  %v717_v15 = vor.u32 %v773_v13, %v716_v12  ;;  %v781_v17 = vld [vmem:[#allocation8 + $0x28] sm:$0xff]  ;;  %v780_v20 = vld [vmem:[#allocation8 + $0x20] sm:$0xff]  ;;  %vm522_vm1 = vcmp.lt.s32.totalorder %v521_v23, 10  ;;  %v497_v59 = vshrl.u32 %v496_v21, 7  ;;  %s766_s7 = sshll.u32 %s1130_s22, 3 }
  0x54   : > { %v325_v16 = vunpack.c.l.bf16 %v323_v14  ;;  %v779_v22 = vld [vmem:[#allocation8 + $0x18] sm:$0xff]  ;;  %v778_v24 = vld [vmem:[#allocation8 + $0x10] sm:$0xff]  ;;  %v777_v26 = vld [vmem:[#allocation8 + $0x8] sm:$0xff]  ;;  %v326_v34 = vunpack.c.h.bf16 %v323_v14  ;;  %s576_s26 = scalar_lea.hbm %s1337_s5, %s766_s7  ;;  %s319_s10 = scalar_lea.vmem [#allocation10], %s705_s28 }
  0x55   : > { %374 = vmatpush.bf16.msra.mxu0 %v725_v11  ;;  %v776_v28 = vld [vmem:[#allocation8] sm:$0xff]  ;;  %v1281_v30 = vld [vmem:[%s1255_s8 + $0x8] sm:$0xff]  ;;  %v864_v45 = vld [vmem:[%s1336_s4] ss:$0 sm:$0xff]  ;;  %v498_v61 = vadd.s32 8, %v497_v59  ;;  %v500_v2 = vadd.s32 %v499_v62, %v497_v59  ;;  %s578_s12 = sshll.u32 %s319_s10, 4  ;;  %s579_s12 = int_to_ptr.vmem [resolvable:$true] %s578_s12 }
  0x56   : > { %389 = vmatpush.bf16.msra.mxu1 %v721_v5  ;;  %474 = vmatpush.bf16.msra.mxu2 %v782_v8  ;;  %v327_v18 = vmul.f32 %v325_v16, %v325_v16  ;;  %v1278_v29 = vld [vmem:[%s1255_s8] sm:$0xff]  ;;  %v328_v35 = vmul.f32 %v326_v34, %v326_v34  ;;  %s580_s29 = sshll.u32 %s576_s26, 4  ;;  %s566_s22 = scalar_lea.sflag [#allocation4], %s1241_s11  ;;  %s581_s29 = int_to_ptr.hbm [resolvable:$true] %s580_s29 }
  0x57   : > { %v408_v31 = vpack.c.bf16 %v1281_v30, %v1278_v29  ;;  %v501_v3 = vadd.s32 %v499_v62, %v498_v61  ;;  %vm502_vm4 = vcmp.lt.s32.totalorder %v500_v2, 24  ;;  %s1007_s6 = sshra.s32 %s581_s29, 4  ;;  %s1013_s28 = scalar_lea.hbm %s1337_s5, 16  ;;  %s1008_s6 = int_to_ptr.hbm [resolvable:$true] %s1007_s6 }
  0x58   : > { %v330_v19 = vsel %vm329_vm0, %v327_v18, 0.0  ;;  %v333_v36 = vsel %vm329_vm0, %v328_v35, 0.0  ;;  %s1009_s8 = scalar_lea.hbm %s1008_s6, 8  ;;  %p1014_p2 = scmp.lt.s32.totalorder %s1008_s6, %s1337_s5 }
  0x59   : > { %731 = vmatmul.msk.bf16.vlgmr.msra.gmra.mxu1 %vm329_vm0, %v771_v6  ;;  %375 = vmatpush.bf16.msra.mxu0 %v717_v15  ;;  %vm503_vm5 = vcmp.lt.s32.totalorder %v501_v3, 24  ;;  %p1010_p1 = scmp.ne.s32.totalorder %s1008_s6, %s1009_s8  ;;  %p1015_p10 = scmp.lt.s32.totalorder %s1013_s28, %s1009_s8 }
  0x5a   : > { %475 = vmatpush.bf16.msra.mxu2 %v781_v17  ;;  %331 = vadd.xlane.f32.xlu2 %v330_v19 }
  0x5b   : > { %p1011_p4 = pnand %p1010_p1, %p1184_p5  ;;  %p1016_p11 = por %p1015_p10, %p1014_p2 }
  0x5c   : > { %730 = vmatmul.msk.bf16.vlgmr.msra.gmra.mxu0 %vm329_vm0, %v771_v6 }
  0x5d   : > { %p1012_p8 = pneg %p1011_p4 }
  0x5e   : > { %476 = vmatpush.bf16.msra.mxu2 %v780_v20 }
  0x5f   : > { %p1017_p9 = pnand %p1016_p11, %p1012_p8 }
  0x62   : > { %477 = vmatpush.bf16.msra.mxu2 %v779_v22  ;;  %334 = vadd.xlane.f32.xlu2 %v333_v36 }
  0x66   : > { %478 = vmatpush.bf16.msra.mxu2 %v778_v24 }
  0x6a   : > { %479 = vmatpush.bf16.msra.mxu2 %v777_v26 }
  0x6e   : > { %480 = vmatpush.bf16.msra.mxu2 %v776_v28 }
  0x71   : > { %481 = vmatmul.bf16.vlgmr.msra.gmra.mxu2 %v408_v31 }
  0xcd   : > { %v332_v46 = vpop.xlane.xlu2 %331 }
  0xce   : > { %v400_v47 = vadd.f32 %v864_v45, %v332_v46 }
  0xd5   : > { %v335_v52 = vpop.xlane.xlu2 %334 }
  0xd6   : > { %v1274_v25 = vpop.f32.mrf.mxu1  ;;  %v401_v55 = vadd.f32 %v864_v45, %v335_v52 }
  0xd7   : > { %v523_v27 = vsel %vm522_vm1, %v1274_v25, -1e+30 }
  0xd8   : > { %525 = vmax.xlane.f32.xlu0 %v523_v27 }
  0xd9   : > { %v377_v48 = vpop.f32.mrf.mxu0 }
  0xda   : > { %v402_v49 = vadd.f32 %v400_v47, %v377_v48 }
  0xdc   : > { %v404_v50 = vmax.f32 %v402_v49, 0.0 }
  0xde   : > { %v1285_v32 = vpop.f32.mrf.mxu1  ;;  %v489_v54 = vsub.f32 64.0, %v404_v50 }
  0xdf   : > { %v524_v33 = vsel %vm522_vm1, %v1285_v32, -1e+30 }
  0xe0   : > { %527 = vmax.xlane.f32.xlu0 %v524_v33  ;;  %v491_v57 = vmax.f32 %v489_v54, 0.0 }
  0xe1   : > { %v379_v53 = vpop.f32.mrf.mxu0 }
  0xe2   : > { %v403_v56 = vadd.f32 %v401_v55, %v379_v53 }
  0xe4   : > { %v405_v58 = vmax.f32 %v403_v56, 0.0 }
  0xe6   : > { %v490_v60 = vsub.f32 64.0, %v405_v58 }
  0xe8   : > { %v492_v0 = vmax.f32 %v490_v60, 0.0 }
  0xf4   : > { %v482_v51 = vpop.f32.mrf.mxu2 }
  0xf5   : > { %vm487_vm2 = vcmp.eq.f32.partialorder %v482_v51, 0.0 }
  0xf6   : > { %v493_v63 = vsel %vm487_vm2, %v491_v57, %v404_v50 }
  0xf7   : > { %v508_v5 = vsel %vm502_vm4, %v493_v63, 0.0 }
  0xfc   : > { %v484_v1 = vpop.f32.mrf.mxu2 }
  0xfd   : > { %vm488_vm3 = vcmp.eq.f32.partialorder %v484_v1, 0.0 }
  0xfe   : > { %v494_v4 = vsel %vm488_vm3, %v492_v0, %v405_v58 }
  0xff   : > { %v509_v6 = vsel %vm503_vm5, %v494_v4, 0.0 }
 0x100   : > { %v510_v7 = vadd.f32 %v509_v6, %v508_v5 }
 0x102   : > { %511 = vadd.xlane.f32.xlu0 %v510_v7 }
 0x14b   : > { %v526_v37 = vpop.xlane.xlu0 %525 }
 0x14c   : > { %v529_v38 = vsub.f32 %v523_v27, %v526_v37 }
 0x14e   : > { %v531_v39 = vmul.f32 1.442695, %v529_v38 }
 0x150   : > { %865 = vpow2.f32 %v531_v39 }
 0x153   : > { %v528_v40 = vpop.xlane.xlu0 %527 }
 0x154   : > { %v530_v41 = vsub.f32 %v524_v33, %v528_v40 }
 0x156   : > { %v866_v42 = vpop.eup %865  ;;  %v533_v43 = vmul.f32 1.442695, %v530_v41 }
 0x157   : > { %535 = vadd.xlane.f32.xlu1 %v866_v42 }
 0x158   : > { %867 = vpow2.f32 %v533_v43 }
 0x15e   : > { %v868_v44 = vpop.eup %867 }
 0x15f   : > { %537 = vadd.xlane.f32.xlu1 %v868_v44 }
 0x175   : > { %v512_v21 = vpop.xlane.xlu0 %511 }
 0x176   : > { %v513_v22 = vrot.slane %v512_v21, 4 }
 0x178   : > { %v514_v23 = vadd.f32 %v513_v22, %v512_v21 }
 0x17a   : > { %v515_v24 = vrot.slane %v514_v23, 2 }
 0x17c   : > { %v516_v26 = vadd.f32 %v515_v24, %v514_v23 }
 0x17e   : > { %v517_v27 = vrot.slane %v516_v26, 1 }
 0x180   : > { %v518_v28 = vadd.f32 %v517_v27, %v516_v26 }
 0x182   : > { %784 = vpush %v518_v28 }
 0x1b3   : > { %s785_s9 = spop %784 }
 0x1b4   : > { %s561_s20 = smul.f32 8.680556e-05, %s785_s9 }
 0x1ca   : > { %v536_v8 = vpop.xlane.xlu1 %535 }
 0x1cb   : > { %869 = vlog2.f32 %v536_v8 }
 0x1d1   : > { %v870_v9 = vpop.eup %869 }
 0x1d2   : > { %v538_v10 = vpop.xlane.xlu1 %537  ;;  %v540_v11 = vmul.f32 0.6931472, %v870_v9 }
 0x1d3   : > { %871 = vlog2.f32 %v538_v10 }
 0x1d4   : > { %v543_v12 = vadd.f32 %v540_v11, %v526_v37 }
 0x1d6   : > { %v545_v16 = vsub.f32 %v1274_v25, %v543_v12 }
 0x1d8   : > { %v547_v18 = vmul.f32 %v545_v16, %v1278_v29 }
 0x1d9   : > { %v872_v13 = vpop.eup %871 }
 0x1da   : > { %v542_v14 = vmul.f32 0.6931472, %v872_v13 }
 0x1dc   : > { %v544_v15 = vadd.f32 %v542_v14, %v528_v40 }
 0x1de   : > { %v546_v17 = vsub.f32 %v1285_v32, %v544_v15 }
 0x1e0   : > { %v548_v19 = vmul.f32 %v546_v17, %v1281_v30 }
 0x1e2   : > { %v549_v20 = vadd.f32 %v548_v19, %v547_v18 }
 0x1e4   : > { %550 = vadd.xlane.f32.xlu1 %v549_v20 }
 0x257   : > { %v551_v31 = vpop.xlane.xlu1 %550 }
 0x258   : > { %v552_v25 = vrot.slane %v551_v31, 4 }
 0x25a   : > { %v553_v33 = vadd.f32 %v552_v25, %v551_v31 }
 0x25c   : > { %v554_v32 = vrot.slane %v553_v33, 2 }
 0x25e   : > { %v555_v34 = vadd.f32 %v554_v32, %v553_v33 }
 0x260   : > { %v556_v29 = vrot.slane %v555_v34, 1 }
 0x262   : > { %v557_v35 = vadd.f32 %v556_v29, %v555_v34 }
 0x264   : > { %786 = vpush %v557_v35 }
 0x295   : > { %s787_s14 = spop %786 }
 0x296   : > { %s559_s3 = ssub.f32 0.0, %s787_s14 }
 0x298   : > { %s560_s30 = smul.f32 0.041666668, %s559_s3 }
 0x29a   : > { %s562_s23 = sadd.f32 %s561_s20, %s560_s30 }
 0x29c   : > { %v563_v30 = vstv %s562_s23 }
 0x29d   : > { %564 = vst [vmem:[%s319_s10] sm:$0xff] %v563_v30 }
 0x29e   : > { %1020 = shalt.err (!%p1017_p9)
}
 0x29f   : > { %800 = dma.vmem_to_hbm [thread:$0]  (%p1184_p5), %s579_s12, 128, %s581_s29, %s566_s22  }
 0x2a0 PF: > { %s592_s11 = sand.u32 1, %s1059_s18   ;;  %p1358_p12 = scmp.ge.s32.totalorder %s1071_s21, 2 }
 0x2a1   : > { %s593_s9 = scalar_lea.sflag [#allocation4], %s592_s11 }
 0x2a2   : > { %p817_p13 = pnand %p1358_p12, %p1144_p6 }
 0x2a4   : > { %p818_p0 = pneg %p817_p13 }
 0x2a6   : > { %1054 = dma.done.wait (%p818_p0), %s593_s9, 128  }
 0x2a7   : > { %1056 = vsyncadd (%p818_p0), %s593_s9, 4294967168  ;;  %s1359_s14 = sld [smem:[#allocation16_spill]]  ;;  %p22_p3 = scmp.ge.s32.totalorder %s1171_s16, 4  }
 0x2a8   : > { %s1360_s20 = sld [smem:[#allocation17_spill]]  ;;  %s1361_s18 = smov %s1063_s19 }
 0x2a9   : > { %s1363_s21 = smov %s1171_s16  ;;  %24 = sbr.rel (!%p22_p3) target bundleno = 11 (0xb), region = 106 }
 0x2ad   : > { %s1362_s19 = smov %s1359_s14 }
 0x2ae   :  { %599 = vsyncpa [#allocation3], 1 }
 0x2af   :  { %601 = vsyncpa [#allocation3 + $0x1], 1 }
 0x2b0   :  { %602 = vsyncpa [#allocation6], 1 }
 0x2b1   :  { %604 = vsyncpa [#allocation6 + $0x1], 1 }
 0x2b2   :  { %605 = vsyncpa [#allocation9], 1 }
 0x2b3   :  { %606 = vsyncpa [#allocation4], 1 }
 0x2b4   :  { %608 = vsyncpa [#allocation4 + $0x1], 1 }

// kernel: tpu_custom_call.1
= control target key start
LH: loop header
LB: loop body
LE: loop exit
PB: predicated region body
PF: predicated region fallthrough
CT: control target
= control target key end

     0   :  { %s1332_s0 = inlined_call_operand.hbm [shape: bf16[32,32], index: 0, kind: input, shape index: {}]   ;;  %s1333_s1 = inlined_call_operand.hbm [shape: f32[32,128], index: 1, kind: input, shape index: {}]   ;;  %s1334_s2 = inlined_call_operand.hbm [shape: bf16[32,256], index: 2, kind: input, shape index: {}]   ;;  %s1335_s3 = inlined_call_operand.hbm [shape: bf16[128,128], index: 3, kind: input, shape index: {}]   ;;  %s1336_s4 = inlined_call_operand.vmem [shape: f32[1,128], index: 4, kind: input, shape index: {}]   ;;  %s1337_s5 = inlined_call_operand.hbm [shape: f32[2,8,128], index: 5, kind: output, shape index: {}]  }
   0x1   :  { %1343 = sst [smem:[#allocation18_spill]] %s1334_s2 }
   0x2   :  { %1344 = sst [smem:[#allocation19_spill]] %s1335_s3 }
   0x3   :  { %10 = vsyncpa [#allocation3], 0 }
   0x4   :  { %12 = vsyncpa [#allocation3 + $0x1], 0 }
   0x5   :  { %13 = vsyncpa [#allocation6], 0 }
   0x6   :  { %15 = vsyncpa [#allocation6 + $0x1], 0 }
   0x7   :  { %16 = vsyncpa [#allocation9], 0 }
   0x8   :  { %17 = vsyncpa [#allocation4], 0 }
   0x9   :  { %19 = vsyncpa [#allocation4 + $0x1], 0  ;;  %s1109_s18 = smov 0   ;;  %s1111_s19 = smov 0  }
   0xa   :  { %s1113_s20 = smov 0   ;;  %s1115_s21 = smov 0  }
   0xb LB: > { %1345 = sst [smem:[#allocation16_spill]] %s1067_s20  ;;  %s1130_s22 = sadd.s32 4294967295, %s1071_s21   ;;  %s1071_s21 = sphi %s1115_s21, %s1363_s21   ;;  %s1067_s20 = sphi %s1113_s20, %s1360_s20   ;;  %s1063_s19 = sphi %s1111_s19, %s1362_s19   ;;  %s1059_s18 = sphi %s1109_s18, %s1361_s18  }
   0xc   : > { %s693_s23 = sadd.s32 4294967294, %s1071_s21   ;;  %p45_p0 = scmp.ne.s32.totalorder %s1063_s19, %s1059_s18 }
   0xd   : > { %p46_p1 = scmp.eq.s32.totalorder %s1130_s22, 0  ;;  %p158_p2 = scmp.eq.s32.totalorder %s1130_s22, 1 }
   0xe   : > { %p164_p3 = scmp.eq.s32.totalorder %s693_s23, 1  ;;  %p694_p5 = scmp.ge.s32.totalorder %s1071_s21, 1 }
   0xf   : > { %p1139_p4 = por %p46_p1, %p45_p0  ;;  %p171_p7 = scmp.lt.s32.totalorder %s1071_s21, 3 }
  0x10   : > { %p1144_p6 = por %p164_p3, %p45_p0  ;;  %s1348_s2 = sld [smem:[#allocation18_spill]] }
  0x11   : > { %p1152_p8 = pnand %p694_p5, %p171_p7  ;;  %s1073_s30 = smov [#allocation7]  }
  0x12   : > { %s184_s6 = sshll.u32 %s1073_s30, 4  ;;  %s1350_s3 = sld [smem:[#allocation19_spill]]  ;;  %s185_s6 = int_to_ptr.vmem [resolvable:$true] %s184_s6 }
  0x13   : > { %p802_p9 = pneg %p1152_p8  ;;  %s1338_s10 = smov 128  }
  0x14   : > { %s1339_s11 = smov 8   ;;  %s1076_s12 = smov [#allocation8]  }
  0x15   : > { %p803_p10 = pnand %p802_p9, %p46_p1  ;;  %s198_s13 = sshll.u32 %s1076_s12, 4  ;;  %s199_s13 = int_to_ptr.vmem [resolvable:$true] %s198_s13 }
  0x16   : > { %s182_s28 = sshll.u32 %s1348_s2, 4  ;;  %s1340_s14 = smov 64   ;;  %s183_s28 = int_to_ptr.hbm [resolvable:$true] %s182_s28 }
  0x17   : > { %805 = dma.hbm_to_vmem [thread:$0]  (!%p803_p10), %s183_s28, 512, %s185_s6, [#allocation6], %s1338_s10, %s1338_s10, %s1339_s11  }
  0x18   : > { %s196_s9 = sshll.u32 %s1350_s3, 4  ;;  %s1341_s15 = smov 4   ;;  %s197_s9 = int_to_ptr.hbm [resolvable:$true] %s196_s9 }
  0x19   : > { %808 = dma.hbm_to_vmem [thread:$0]  (!%p803_p10), %s197_s9, 1024, %s199_s13, [#allocation9], %s1340_s14, %s1340_s14, %s1341_s15  }
  0x1a   : > { %s1171_s16 = sadd.s32 1, %s1071_s21   ;;  %s32_s23 = sadd.s32 1, %s1067_s20 }
  0x1b   : > { %s29_s17 = ssub.s32 %s1071_s21, %s1171_s16  ;;  %p39_p13 = scmp.ne.s32.totalorder %s1067_s20, %s1063_s19 }
  0x1c   : > { %p30_p12 = scmp.eq.s32.totalorder %s29_s17, 0  ;;  %p40_p0 = scmp.eq.s32.totalorder %s1071_s21, 0 }
  0x1d   : > { %p1184_p5 = por %p158_p2, %p39_p13  ;;  %p822_p7 = scmp.lt.s32.totalorder %s1071_s21, 2 }
  0x1e   : > { %s1180_s26 = scalar_select %p30_p12, %s1067_s20, %s32_s23  }
  0x1f   : > { %p41_p3 = por %p40_p0, %p39_p13  ;;  %s1190_s28 = sand.u32 1, %s1067_s20  }
  0x20   : > { %1351 = sst [smem:[#allocation17_spill]] %s1180_s26  ;;  %s698_s30 = sshll.u32 %s1190_s28, 3 }
  0x21   : > { %s769_s6 = sshll.u32 %s1071_s21, 3  ;;  %s219_s12 = scalar_lea.vmem [#allocation2], %s698_s30 }
  0x22   : > { %s224_s9 = scalar_lea.hbm %s1332_s0, %s769_s6  ;;  %s227_s13 = sshll.u32 %s219_s12, 4  ;;  %s228_s13 = int_to_ptr.vmem [resolvable:$true] %s227_s13 }
  0x23   : > { %s225_s17 = sshll.u32 %s224_s9, 4  ;;  %p1197_p2 = pnand %p822_p7, %p41_p3  ;;  %s226_s17 = int_to_ptr.hbm [resolvable:$true] %s225_s17 }
  0x24   : > { %s237_s10 = sand.u32 1, %s1071_s21   ;;  %s701_s11 = sshll.u32 %s1190_s28, 4 }
  0x25   : > { %s216_s14 = scalar_lea.sflag [#allocation3], %s1190_s28  ;;  %s933_s15 = sshra.s32 %s226_s17, 4  ;;  %s934_s15 = int_to_ptr.hbm [resolvable:$true] %s933_s15 }
  0x26   : > { %s935_s2 = scalar_lea.hbm %s934_s15, 8  ;;  %p937_p10 = pneg %p1197_p2 }
  0x27   : > { %p936_p9 = scmp.ne.s32.totalorder %s934_s15, %s935_s2  ;;  %s940_s7 = scalar_lea.hbm %s1332_s0, 16 }
  0x28   : > { %p941_p0 = scmp.lt.s32.totalorder %s934_s15, %s1332_s0  ;;  %p942_p3 = scmp.lt.s32.totalorder %s940_s7, %s935_s2 }
  0x29   : > { %p938_p12 = pnand %p937_p10, %p936_p9 }
  0x2a   : > { %p943_p7 = por %p942_p3, %p941_p0 }
  0x2b   : > { %p939_p13 = pneg %p938_p12 }
  0x2d   : > { %p944_p11 = pnand %p943_p7, %p939_p13 }
  0x2f   : > { %947 = shalt.err (!%p944_p11)
}
  0x30   : > { %s1354_s28 = smov 4   ;;  %s1355_s12 = smov 64  }
  0x31   : > { %812 = dma.hbm_to_vmem [thread:$0]  (!%p1197_p2), %s226_s17, 128, %s228_s13, %s216_s14, %s1355_s12, %s1355_s12, %s1354_s28  }
  0x32   : > { %s770_s3 = sshll.u32 %s1071_s21, 4  ;;  %s241_s20 = scalar_lea.vmem [#allocation5], %s701_s11 }
  0x33   : > { %s246_s6 = scalar_lea.hbm %s1333_s1, %s770_s3  ;;  %s249_s8 = sshll.u32 %s241_s20, 4  ;;  %s250_s8 = int_to_ptr.vmem [resolvable:$true] %s249_s8 }
  0x34   : > { %s247_s15 = sshll.u32 %s246_s6, 4  ;;  %s238_s2 = scalar_lea.sflag [#allocation6], %s237_s10  ;;  %s248_s15 = int_to_ptr.hbm [resolvable:$true] %s247_s15 }
  0x35   : > { %s963_s7 = sshra.s32 %s248_s15, 4  ;;  %s970_s17 = scalar_lea.hbm %s1333_s1, 32  ;;  %s964_s7 = int_to_ptr.hbm [resolvable:$true] %s963_s7 }
  0x36   : > { %s965_s9 = scalar_lea.hbm %s964_s7, 16  ;;  %p971_p13 = scmp.lt.s32.totalorder %s964_s7, %s1333_s1 }
  0x37   : > { %p966_p11 = scmp.ne.s32.totalorder %s964_s7, %s965_s9  ;;  %p972_p0 = scmp.lt.s32.totalorder %s970_s17, %s965_s9 }
  0x39   : > { %p968_p9 = pnand %p966_p11, %p937_p10  ;;  %p973_p3 = por %p972_p0, %p971_p13 }
  0x3b   : > { %p969_p12 = pneg %p968_p9 }
  0x3d   : > { %p974_p7 = pnand %p973_p3, %p969_p12 }
  0x3f   : > { %977 = shalt.err (!%p974_p7)
}
  0x40   : > { %s1356_s20 = smov 8   ;;  %s1357_s10 = smov 128  }
  0x41   : > { %815 = dma.hbm_to_vmem [thread:$0]  (!%p1197_p2), %s248_s15, 256, %s250_s8, %s238_s2, %s1357_s10, %s1357_s10, %s1356_s20  }
  0x42   : > { %261 = sbr.rel (%p1152_p8) target bundleno = 672 (0x2a0), region = 40  ;;  %s1241_s11 = sand.u32 (!%p1152_p8), 1, %s1063_s19  }
  0x43   : > { %s705_s28 = sshll.u32 (!%p1152_p8), %s1241_s11, 3  ;;  %s264_s12 = scalar_lea.sflag (!%p1152_p8), [#allocation3], %s1241_s11 }
  0x44   : > { %s1247_s30 = scalar_lea.vmem (!%p1152_p8), [#allocation2], %s705_s28 }
  0x47   : > { %1038 = dma.done.wait (%p1139_p4), %s264_s12, 128  }
  0x48   : > { %1040 = vsyncadd (%p1139_p4), %s264_s12, 4294967168  ;;  %s273_s29 = sand.u32 1, %s1130_s22   ;;  %s706_s23 = sshll.u32 %s1241_s11, 4 }
  0x49   : > { %s274_s6 = scalar_lea.sflag [#allocation6], %s273_s29  ;;  %s1255_s8 = scalar_lea.vmem [#allocation5], %s706_s23 }
  0x4a   : > { %1042 = dma.done.wait (%p1139_p4), %s274_s6, 256  }
  0x4b   : > { %1044 = vsyncadd (%p1139_p4), %s274_s6, 4294967040 }
  0x4c   : > { %1046 = dma.done.wait (%p46_p1), [#allocation6], 512  }
  0x4d   : > { %1048 = vsyncadd (%p46_p1), [#allocation6], 4294966784 }
  0x4e   : > { %1050 = dma.done.wait (%p46_p1), [#allocation9], 1024  }
  0x4f   : > { %1052 = vsyncadd (%p46_p1), [#allocation9], 4294966272  ;;  %v774_v0 = vld [vmem:[#allocation7 + $0x14] sm:$0xf]  ;;  %v726_v1 = vld [vmem:[#allocation7 + $0x18] sm:$0xf0]  ;;  %v496_v21 = vlaneseq }
  0x50   : > { %v772_v2 = vld [vmem:[#allocation7 + $0x4] sm:$0xf]  ;;  %v729_v3 = vor.u32 %v774_v0, %v726_v1  ;;  %v718_v4 = vld [vmem:[#allocation7 + $0x8] sm:$0xf0]  ;;  %v771_v6 = vld [vmem:[%s1247_s30] sm:$0xff]  ;;  %vm329_vm0 = vcmask 261120  }
  0x51   : > { %v721_v5 = vor.u32 %v772_v2, %v718_v4  ;;  %v783_v7 = vld [vmem:[#allocation8 + $0x38] sm:$0xff]  ;;  %v782_v8 = vld [vmem:[#allocation8 + $0x30] sm:$0xff]  ;;  %v716_v12 = vld [vmem:[#allocation7] sm:$0xf]  ;;  %v521_v23 = vand.u32 127, %v496_v21  ;;  %s764_s2 = sshll.u32 %s1130_s22, 4 }
  0x52   : > { %388 = vmatpush.bf16.msra.mxu1 %v729_v3  ;;  %473 = vmatpush.bf16.msra.mxu2 %v783_v7  ;;  %v724_v9 = vld [vmem:[#allocation7 + $0x10] sm:$0xf]  ;;  %v775_v10 = vld [vmem:[#allocation7 + $0x14] sm:$0xf0]  ;;  %v773_v13 = vld [vmem:[#allocation7 + $0x4] sm:$0xf0]  ;;  %v499_v62 = vstv %s764_s2 }
  0x53   : > { %v725_v11 = vor.u32 %v775_v10, %v724_v9  ;;  %v323_v14 = vld [vmem:[%s1247_s30] sm:$0xff]   ;;  %v717_v15 = vor.u32 %v773_v13, %v716_v12  ;;  %v781_v17 = vld [vmem:[#allocation8 + $0x28] sm:$0xff]  ;;  %v780_v20 = vld [vmem:[#allocation8 + $0x20] sm:$0xff]  ;;  %vm522_vm1 = vcmp.lt.s32.totalorder %v521_v23, 10  ;;  %v497_v59 = vshrl.u32 %v496_v21, 7  ;;  %s766_s7 = sshll.u32 %s1130_s22, 3 }
  0x54   : > { %v325_v16 = vunpack.c.l.bf16 %v323_v14  ;;  %v779_v22 = vld [vmem:[#allocation8 + $0x18] sm:$0xff]  ;;  %v778_v24 = vld [vmem:[#allocation8 + $0x10] sm:$0xff]  ;;  %v777_v26 = vld [vmem:[#allocation8 + $0x8] sm:$0xff]  ;;  %v326_v34 = vunpack.c.h.bf16 %v323_v14  ;;  %s576_s26 = scalar_lea.hbm %s1337_s5, %s766_s7  ;;  %s319_s10 = scalar_lea.vmem [#allocation10], %s705_s28 }
  0x55   : > { %374 = vmatpush.bf16.msra.mxu0 %v725_v11  ;;  %v776_v28 = vld [vmem:[#allocation8] sm:$0xff]  ;;  %v1281_v30 = vld [vmem:[%s1255_s8 + $0x8] sm:$0xff]  ;;  %v864_v45 = vld [vmem:[%s1336_s4] ss:$0 sm:$0xff]  ;;  %v498_v61 = vadd.s32 8, %v497_v59  ;;  %v500_v2 = vadd.s32 %v499_v62, %v497_v59  ;;  %s578_s12 = sshll.u32 %s319_s10, 4  ;;  %s579_s12 = int_to_ptr.vmem [resolvable:$true] %s578_s12 }
  0x56   : > { %389 = vmatpush.bf16.msra.mxu1 %v721_v5  ;;  %474 = vmatpush.bf16.msra.mxu2 %v782_v8  ;;  %v327_v18 = vmul.f32 %v325_v16, %v325_v16  ;;  %v1278_v29 = vld [vmem:[%s1255_s8] sm:$0xff]  ;;  %v328_v35 = vmul.f32 %v326_v34, %v326_v34  ;;  %s580_s29 = sshll.u32 %s576_s26, 4  ;;  %s566_s22 = scalar_lea.sflag [#allocation4], %s1241_s11  ;;  %s581_s29 = int_to_ptr.hbm [resolvable:$true] %s580_s29 }
  0x57   : > { %v408_v31 = vpack.c.bf16 %v1281_v30, %v1278_v29  ;;  %v501_v3 = vadd.s32 %v499_v62, %v498_v61  ;;  %vm502_vm4 = vcmp.lt.s32.totalorder %v500_v2, 24  ;;  %s1007_s6 = sshra.s32 %s581_s29, 4  ;;  %s1013_s28 = scalar_lea.hbm %s1337_s5, 16  ;;  %s1008_s6 = int_to_ptr.hbm [resolvable:$true] %s1007_s6 }
  0x58   : > { %v330_v19 = vsel %vm329_vm0, %v327_v18, 0.0  ;;  %v333_v36 = vsel %vm329_vm0, %v328_v35, 0.0  ;;  %s1009_s8 = scalar_lea.hbm %s1008_s6, 8  ;;  %p1014_p2 = scmp.lt.s32.totalorder %s1008_s6, %s1337_s5 }
  0x59   : > { %731 = vmatmul.msk.bf16.vlgmr.msra.gmra.mxu1 %vm329_vm0, %v771_v6  ;;  %375 = vmatpush.bf16.msra.mxu0 %v717_v15  ;;  %vm503_vm5 = vcmp.lt.s32.totalorder %v501_v3, 24  ;;  %p1010_p1 = scmp.ne.s32.totalorder %s1008_s6, %s1009_s8  ;;  %p1015_p10 = scmp.lt.s32.totalorder %s1013_s28, %s1009_s8 }
  0x5a   : > { %475 = vmatpush.bf16.msra.mxu2 %v781_v17  ;;  %331 = vadd.xlane.f32.xlu2 %v330_v19 }
  0x5b   : > { %p1011_p4 = pnand %p1010_p1, %p1184_p5  ;;  %p1016_p11 = por %p1015_p10, %p1014_p2 }
  0x5c   : > { %730 = vmatmul.msk.bf16.vlgmr.msra.gmra.mxu0 %vm329_vm0, %v771_v6 }
  0x5d   : > { %p1012_p8 = pneg %p1011_p4 }
  0x5e   : > { %476 = vmatpush.bf16.msra.mxu2 %v780_v20 }
  0x5f   : > { %p1017_p9 = pnand %p1016_p11, %p1012_p8 }
  0x62   : > { %477 = vmatpush.bf16.msra.mxu2 %v779_v22  ;;  %334 = vadd.xlane.f32.xlu2 %v333_v36 }
  0x66   : > { %478 = vmatpush.bf16.msra.mxu2 %v778_v24 }
  0x6a   : > { %479 = vmatpush.bf16.msra.mxu2 %v777_v26 }
  0x6e   : > { %480 = vmatpush.bf16.msra.mxu2 %v776_v28 }
  0x71   : > { %481 = vmatmul.bf16.vlgmr.msra.gmra.mxu2 %v408_v31 }
  0xcd   : > { %v332_v46 = vpop.xlane.xlu2 %331 }
  0xce   : > { %v400_v47 = vadd.f32 %v864_v45, %v332_v46 }
  0xd5   : > { %v335_v52 = vpop.xlane.xlu2 %334 }
  0xd6   : > { %v1274_v25 = vpop.f32.mrf.mxu1  ;;  %v401_v55 = vadd.f32 %v864_v45, %v335_v52 }
  0xd7   : > { %v523_v27 = vsel %vm522_vm1, %v1274_v25, -1e+30 }
  0xd8   : > { %525 = vmax.xlane.f32.xlu0 %v523_v27 }
  0xd9   : > { %v377_v48 = vpop.f32.mrf.mxu0 }
  0xda   : > { %v402_v49 = vadd.f32 %v400_v47, %v377_v48 }
  0xdc   : > { %v404_v50 = vmax.f32 %v402_v49, 0.0 }
  0xde   : > { %v1285_v32 = vpop.f32.mrf.mxu1  ;;  %v489_v54 = vsub.f32 64.0, %v404_v50 }
  0xdf   : > { %v524_v33 = vsel %vm522_vm1, %v1285_v32, -1e+30 }
  0xe0   : > { %527 = vmax.xlane.f32.xlu0 %v524_v33  ;;  %v491_v57 = vmax.f32 %v489_v54, 0.0 }
  0xe1   : > { %v379_v53 = vpop.f32.mrf.mxu0 }
  0xe2   : > { %v403_v56 = vadd.f32 %v401_v55, %v379_v53 }
  0xe4   : > { %v405_v58 = vmax.f32 %v403_v56, 0.0 }
  0xe6   : > { %v490_v60 = vsub.f32 64.0, %v405_v58 }
  0xe8   : > { %v492_v0 = vmax.f32 %v490_v60, 0.0 }
  0xf4   : > { %v482_v51 = vpop.f32.mrf.mxu2 }
  0xf5   : > { %vm487_vm2 = vcmp.eq.f32.partialorder %v482_v51, 0.0 }
  0xf6   : > { %v493_v63 = vsel %vm487_vm2, %v491_v57, %v404_v50 }
  0xf7   : > { %v508_v5 = vsel %vm502_vm4, %v493_v63, 0.0 }
  0xfc   : > { %v484_v1 = vpop.f32.mrf.mxu2 }
  0xfd   : > { %vm488_vm3 = vcmp.eq.f32.partialorder %v484_v1, 0.0 }
  0xfe   : > { %v494_v4 = vsel %vm488_vm3, %v492_v0, %v405_v58 }
  0xff   : > { %v509_v6 = vsel %vm503_vm5, %v494_v4, 0.0 }
 0x100   : > { %v510_v7 = vadd.f32 %v509_v6, %v508_v5 }
 0x102   : > { %511 = vadd.xlane.f32.xlu0 %v510_v7 }
 0x14b   : > { %v526_v37 = vpop.xlane.xlu0 %525 }
 0x14c   : > { %v529_v38 = vsub.f32 %v523_v27, %v526_v37 }
 0x14e   : > { %v531_v39 = vmul.f32 1.442695, %v529_v38 }
 0x150   : > { %865 = vpow2.f32 %v531_v39 }
 0x153   : > { %v528_v40 = vpop.xlane.xlu0 %527 }
 0x154   : > { %v530_v41 = vsub.f32 %v524_v33, %v528_v40 }
 0x156   : > { %v866_v42 = vpop.eup %865  ;;  %v533_v43 = vmul.f32 1.442695, %v530_v41 }
 0x157   : > { %535 = vadd.xlane.f32.xlu1 %v866_v42 }
 0x158   : > { %867 = vpow2.f32 %v533_v43 }
 0x15e   : > { %v868_v44 = vpop.eup %867 }
 0x15f   : > { %537 = vadd.xlane.f32.xlu1 %v868_v44 }
 0x175   : > { %v512_v21 = vpop.xlane.xlu0 %511 }
 0x176   : > { %v513_v22 = vrot.slane %v512_v21, 4 }
 0x178   : > { %v514_v23 = vadd.f32 %v513_v22, %v512_v21 }
 0x17a   : > { %v515_v24 = vrot.slane %v514_v23, 2 }
 0x17c   : > { %v516_v26 = vadd.f32 %v515_v24, %v514_v23 }
 0x17e   : > { %v517_v27 = vrot.slane %v516_v26, 1 }
 0x180   : > { %v518_v28 = vadd.f32 %v517_v27, %v516_v26 }
 0x182   : > { %784 = vpush %v518_v28 }
 0x1b3   : > { %s785_s9 = spop %784 }
 0x1b4   : > { %s561_s20 = smul.f32 8.680556e-05, %s785_s9 }
 0x1ca   : > { %v536_v8 = vpop.xlane.xlu1 %535 }
 0x1cb   : > { %869 = vlog2.f32 %v536_v8 }
 0x1d1   : > { %v870_v9 = vpop.eup %869 }
 0x1d2   : > { %v538_v10 = vpop.xlane.xlu1 %537  ;;  %v540_v11 = vmul.f32 0.6931472, %v870_v9 }
 0x1d3   : > { %871 = vlog2.f32 %v538_v10 }
 0x1d4   : > { %v543_v12 = vadd.f32 %v540_v11, %v526_v37 }
 0x1d6   : > { %v545_v16 = vsub.f32 %v1274_v25, %v543_v12 }
 0x1d8   : > { %v547_v18 = vmul.f32 %v545_v16, %v1278_v29 }
 0x1d9   : > { %v872_v13 = vpop.eup %871 }
 0x1da   : > { %v542_v14 = vmul.f32 0.6931472, %v872_v13 }
 0x1dc   : > { %v544_v15 = vadd.f32 %v542_v14, %v528_v40 }
 0x1de   : > { %v546_v17 = vsub.f32 %v1285_v32, %v544_v15 }
 0x1e0   : > { %v548_v19 = vmul.f32 %v546_v17, %v1281_v30 }
 0x1e2   : > { %v549_v20 = vadd.f32 %v548_v19, %v547_v18 }
 0x1e4   : > { %550 = vadd.xlane.f32.xlu1 %v549_v20 }
 0x257   : > { %v551_v31 = vpop.xlane.xlu1 %550 }
 0x258   : > { %v552_v25 = vrot.slane %v551_v31, 4 }
 0x25a   : > { %v553_v33 = vadd.f32 %v552_v25, %v551_v31 }
 0x25c   : > { %v554_v32 = vrot.slane %v553_v33, 2 }
 0x25e   : > { %v555_v34 = vadd.f32 %v554_v32, %v553_v33 }
 0x260   : > { %v556_v29 = vrot.slane %v555_v34, 1 }
 0x262   : > { %v557_v35 = vadd.f32 %v556_v29, %v555_v34 }
 0x264   : > { %786 = vpush %v557_v35 }
 0x295   : > { %s787_s14 = spop %786 }
 0x296   : > { %s559_s3 = ssub.f32 0.0, %s787_s14 }
 0x298   : > { %s560_s30 = smul.f32 0.041666668, %s559_s3 }
 0x29a   : > { %s562_s23 = sadd.f32 %s561_s20, %s560_s30 }
 0x29c   : > { %v563_v30 = vstv %s562_s23 }
 0x29d   : > { %564 = vst [vmem:[%s319_s10] sm:$0xff] %v563_v30 }
 0x29e   : > { %1020 = shalt.err (!%p1017_p9)
}
 0x29f   : > { %800 = dma.vmem_to_hbm [thread:$0]  (%p1184_p5), %s579_s12, 128, %s581_s29, %s566_s22  }
 0x2a0 PF: > { %s592_s11 = sand.u32 1, %s1059_s18   ;;  %p1358_p12 = scmp.ge.s32.totalorder %s1071_s21, 2 }
 0x2a1   : > { %s593_s9 = scalar_lea.sflag [#allocation4], %s592_s11 }
 0x2a2   : > { %p817_p13 = pnand %p1358_p12, %p1144_p6 }
 0x2a4   : > { %p818_p0 = pneg %p817_p13 }
 0x2a6   : > { %1054 = dma.done.wait (%p818_p0), %s593_s9, 128  }
 0x2a7   : > { %1056 = vsyncadd (%p818_p0), %s593_s9, 4294967168  ;;  %s1359_s14 = sld [smem:[#allocation16_spill]]  ;;  %p22_p3 = scmp.ge.s32.totalorder %s1171_s16, 4  }
 0x2a8   : > { %s1360_s20 = sld [smem:[#allocation17_spill]]  ;;  %s1361_s18 = smov %s1063_s19 }
 0x2a9   : > { %s1363_s21 = smov %s1171_s16  ;;  %24 = sbr.rel (!%p22_p3) target bundleno = 11 (0xb), region = 106 }
 0x2ad   : > { %s1362_s19 = smov %s1359_s14 }
 0x2ae   :  { %599 = vsyncpa [#allocation3], 1 }
 0x2af   :  { %601 = vsyncpa [#allocation3 + $0x1], 1 }
 0x2b0   :  { %602 = vsyncpa [#allocation6], 1 }
 0x2b1   :  { %604 = vsyncpa [#allocation6 + $0x1], 1 }
 0x2b2   :  { %605 = vsyncpa [#allocation9], 1 }
 0x2b3   :  { %606 = vsyncpa [#allocation4], 1 }
 0x2b4   :  { %608 = vsyncpa [#allocation4 + $0x1], 1 }

</bundles_post_ra>
